<compile_context>
chip_gen: v6e
topology: v6e:2x2x1
jax: 0.10.0
libtpu: 0.0.40
codegen_flags: <defaults>
</compile_context>

<pallas_src>
import functools

import jax
import jax.numpy as jnp
from jax.experimental import pallas as pl
from jax.experimental.pallas import tpu as pltpu

IN_FEATURES = 1024
OUT_FEATURES = 4

# TB=2048: 8 MiB f32 x-tile (16 MiB double-buffered) + ~3 MiB lane-padded
# weight/out buffers + in-kernel bf16 temporaries  ->  ~24 MiB resident.
# We raise the scoped-VMEM limit explicitly so this is safe on v5e (16 MiB
# default scoped), v6e (32 MiB default) and v7x (32 MiB default / 64 MiB phys).
DEFAULT_BLOCK_B = 2048
VMEM_LIMIT_BYTES = 40 << 20


def _linear_kernel(x_ref, w_ref, b_ref, o_ref):
    # x (TB, 1024), w (1024, 4), b (1, 4), o (TB, 4).
    # bf16 operands, f32 accumulation on the MXU; bias add in f32 on the VPU.
    acc = jnp.dot(
        x_ref[...].astype(jnp.bfloat16),
        w_ref[...].astype(jnp.bfloat16),
        preferred_element_type=jnp.float32,
    )
    o_ref[...] = (acc + b_ref[...]).astype(o_ref.dtype)


def prepare_params(weight, bias):
    """One-time layout prep (hoisted out of the per-call path).

    weight: (4, 1024) PyTorch nn.Linear layout -> (1024, 4) row-major matmul
    bias:   (4,)                               -> (1, 4) broadcast over batch
    """
    return weight.T, bias.reshape(1, OUT_FEATURES)


def _round_up(x, m):
    return ((x + m - 1) // m) * m


def _choose_tb(batch, block_b):
    # Tiny batch: single full-array block (exempt from 8-sublane divisibility).
    if batch <= 8:
        return batch
    # Guarantee >= 2 grid steps so v7x's second TensorCore gets work, while
    # keeping the tile a multiple of 8 sublanes.
    half = _round_up(pl.cdiv(batch, 2), 8)
    return min(block_b, half)


@functools.partial(jax.jit, static_argnames=("block_b",))
def regression_forward(x, w_t, b2d, *, block_b=DEFAULT_BLOCK_B):
    """x: (B, 1024); w_t: (1024, 4); b2d: (1, 4)."""
    B = x.shape[0]
    tb = _choose_tb(B, block_b)
    grid = (pl.cdiv(B, tb),)

    cost = pl.CostEstimate(
        flops=2 * B * IN_FEATURES * OUT_FEATURES,
        transcendentals=0,
        bytes_accessed=(
            B * IN_FEATURES * 4                # x read (dominant)
            + IN_FEATURES * OUT_FEATURES * 4   # weight read
            + OUT_FEATURES * 4                 # bias read
            + B * OUT_FEATURES * 4             # out write
        ),
    )

    return pl.pallas_call(
        _linear_kernel,
        out_shape=jax.ShapeDtypeStruct((B, OUT_FEATURES), x.dtype),
        grid_spec=pltpu.PrefetchScalarGridSpec(
            num_scalar_prefetch=0,
            grid=grid,
            in_specs=[
                # x: streamed per batch tile (double-buffered by the runtime).
                pl.BlockSpec((tb, IN_FEATURES), lambda i: (i, 0)),
                # weight: constant index_map -> VMEM-resident across steps.
                pl.BlockSpec((IN_FEATURES, OUT_FEATURES), lambda i: (0, 0)),
                # bias: constant index_map -> VMEM-resident across steps.
                pl.BlockSpec((1, OUT_FEATURES), lambda i: (0, 0)),
            ],
            out_specs=pl.BlockSpec((tb, OUT_FEATURES), lambda i: (i, 0)),
        ),
        compiler_params=pltpu.CompilerParams(
            # Batch tiles are independent -> shard across TCs on v7x megacore.
            dimension_semantics=("parallel",),
            vmem_limit_bytes=VMEM_LIMIT_BYTES,
        ),
        cost_estimate=cost,
    )(x, w_t, b2d)


if __name__ == "__main__":
    key = jax.random.PRNGKey(0)
    kx, kw, kb, kx2, kx3 = jax.random.split(key, 5)

    # Deterministic synthetic parameters (same shapes as nn.Linear(1024, 4)).
    weight = jax.random.normal(kw, (OUT_FEATURES, IN_FEATURES), dtype=jnp.float32) * 0.02
    bias = jax.random.normal(kb, (OUT_FEATURES,), dtype=jnp.float32) * 0.02
    w_t, b2d = prepare_params(weight, bias)

    def ref_f32(xx):
        return xx @ weight.T + bias

    def ref_bf16(xx):
        # Mirrors the in-kernel bf16-operand / f32-accumulate matmul.
        return (
            jnp.dot(
                xx.astype(jnp.bfloat16),
                weight.T.astype(jnp.bfloat16),
                preferred_element_type=jnp.float32,
            )
            + bias
        )

    # --- Small case (single full-array block) ---------------------------------
    B = 2
    x = jax.random.normal(kx, (B, IN_FEATURES), dtype=jnp.float32)
    out = jax.block_until_ready(regression_forward(x, w_t, b2d))
    assert out.shape == (B, OUT_FEATURES)
    assert jnp.allclose(out, ref_bf16(x), atol=1e-3, rtol=1e-3)
    assert jnp.allclose(out, ref_f32(x), atol=3e-2, rtol=3e-2)

    # --- Multi-block case with a partial tail block (3 grid steps, 4-row tail) -
    B2, TB2 = 20, 8
    x2 = jax.random.normal(kx2, (B2, IN_FEATURES), dtype=jnp.float32)
    out2 = jax.block_until_ready(regression_forward(x2, w_t, b2d, block_b=TB2))
    assert out2.shape == (B2, OUT_FEATURES)
    assert jnp.allclose(out2, ref_bf16(x2), atol=1e-3, rtol=1e-3)
    assert jnp.allclose(out2, ref_f32(x2), atol=3e-2, rtol=3e-2)

    # --- Default path: batch auto-split into >=2 tiles (megacore sharding) -----
    B3 = 48
    x3 = jax.random.normal(kx3, (B3, IN_FEATURES), dtype=jnp.float32)
    out3 = jax.block_until_ready(regression_forward(x3, w_t, b2d))
    assert out3.shape == (B3, OUT_FEATURES)
    assert jnp.allclose(out3, ref_bf16(x3), atol=1e-3, rtol=1e-3)
    assert jnp.allclose(out3, ref_f32(x3), atol=3e-2, rtol=3e-2)

    print("KERNEL_OK")
</pallas_src>

<mosaic_0001>
module attributes {stable_mosaic.version = 11 : i64} {
  func.func @_linear_kernel(%arg0: i32, %arg1: memref<2x1024xf32, #tpu.memory_space<vmem>>, %arg2: memref<1024x4xf32, #tpu.memory_space<vmem>>, %arg3: memref<1x4xf32, #tpu.memory_space<vmem>>, %arg4: memref<2x4xf32, #tpu.memory_space<vmem>>) attributes {dimension_semantics = [#tpu.dimension_semantics<parallel>], iteration_bounds = array<i64: 1>, scalar_prefetch = 0 : i64, scratch_operands = 0 : i64, tpu.core_type = #tpu.core_type<tc>, window_params = [{transform_indices = @transform_0, window_bounds = array<i64: 2, 1024>}, {pipeline_mode = #tpu.pipeline_mode<synchronous>, transform_indices = @transform_1, window_bounds = array<i64: 1024, 4>}, {pipeline_mode = #tpu.pipeline_mode<synchronous>, transform_indices = @transform_2, window_bounds = array<i64: 1, 4>}, {transform_indices = @transform_3, window_bounds = array<i64: 2, 4>}]} {
    %c0 = arith.constant 0 : index
    %c0_0 = arith.constant 0 : index
    %0 = vector.load %arg1[%c0, %c0_0] : memref<2x1024xf32, #tpu.memory_space<vmem>>, vector<2x1024xf32>
    %1 = arith.truncf %0 : vector<2x1024xf32> to vector<2x1024xbf16>
    %c0_1 = arith.constant 0 : index
    %c0_2 = arith.constant 0 : index
    %2 = vector.load %arg2[%c0_1, %c0_2] : memref<1024x4xf32, #tpu.memory_space<vmem>>, vector<1024x4xf32>
    %3 = arith.truncf %2 : vector<1024x4xf32> to vector<1024x4xbf16>
    %cst = arith.constant dense<0.000000e+00> : vector<2x4xf32>
    %4 = tpu.matmul %1, %3, %cst {dimension_numbers = #tpu.dot_dimension_numbers<[1], [0], [0], [1], [0, 0, 1, 1], [], []>} : vector<2x1024xbf16>, vector<1024x4xbf16>, vector<2x4xf32> -> vector<2x4xf32>
    %c0_3 = arith.constant 0 : index
    %c0_4 = arith.constant 0 : index
    %5 = vector.load %arg3[%c0_3, %c0_4] : memref<1x4xf32, #tpu.memory_space<vmem>>, vector<1x4xf32>
    %6 = vector.broadcast %5 : vector<1x4xf32> to vector<2x4xf32>
    %7 = arith.addf %4, %6 : vector<2x4xf32>
    %c0_5 = arith.constant 0 : index
    %c0_6 = arith.constant 0 : index
    %8 = vector.load %arg4[%c0_5, %c0_6] : memref<2x4xf32, #tpu.memory_space<vmem>>, vector<2x4xf32>
    tpu.vector_store %arg4[%c0_5, %c0_6], %7 {strides = array<i32>} : memref<2x4xf32, #tpu.memory_space<vmem>>, vector<2x4xf32>,
    return
  }
  func.func @transform_0(%arg0: i32) -> (i32, i32) {
    %c0_i32 = arith.constant 0 : i32
    %c0_i32_0 = arith.constant 0 : i32
    return %arg0, %c0_i32 : i32, i32
  }
  func.func @transform_1(%arg0: i32) -> (i32, i32) {
    %c0_i32 = arith.constant 0 : i32
    %c0_i32_0 = arith.constant 0 : i32
    %c0_i32_1 = arith.constant 0 : i32
    return %c0_i32, %c0_i32_0 : i32, i32
  }
  func.func @transform_2(%arg0: i32) -> (i32, i32) {
    %c0_i32 = arith.constant 0 : i32
    %c0_i32_0 = arith.constant 0 : i32
    %c0_i32_1 = arith.constant 0 : i32
    return %c0_i32, %c0_i32_0 : i32, i32
  }
  func.func @transform_3(%arg0: i32) -> (i32, i32) {
    %c0_i32 = arith.constant 0 : i32
    %c0_i32_0 = arith.constant 0 : i32
    return %arg0, %c0_i32 : i32, i32
  }
}

</mosaic_0001>

<bundles_post_ra>
// kernel: regression_forward.1
= control target key start
LH: loop header
LB: loop body
LE: loop exit
PB: predicated region body
PF: predicated region fallthrough
CT: control target
= control target key end

     0   :  { %v560_v47 = vmov 1983009808   ;;  %v24_v49 = vlaneseq  ;;  %s996_s0 = inlined_call_operand.vmem [shape: f32[2,1024], index: 0, kind: input, shape index: {}]   ;;  %s997_s1 = inlined_call_operand.vmem [shape: f32[1024,4], index: 1, kind: input, shape index: {}]   ;;  %s998_s2 = inlined_call_operand.vmem [shape: f32[1,4], index: 2, kind: input, shape index: {}]   ;;  %s999_s3 = inlined_call_operand.hbm [shape: f32[2,4], index: 3, kind: output, shape index: {}]  }
   0x1   :  { %v100_v0 = vld [vmem:[%s997_s1 + $0xf0] sm:$0xff]  ;;  %v101_v1 = vld [vmem:[%s997_s1 + $0xf8] sm:$0xff]  ;;  %v98_v11 = vld [vmem:[%s997_s1 + $0xe0] sm:$0xff]  ;;  %v22_v48 = vunpack.c.l.s4 %v560_v47 }
   0x2   :  { %v132_v2 = vld [vmem:[%s997_s1 + $0x1f0] sm:$0xff]  ;;  %v213_v3 = vpack.c.bf16 %v101_v1, %v100_v0  ;;  %v133_v4 = vld [vmem:[%s997_s1 + $0x1f8] sm:$0xff]  ;;  %v99_v13 = vld [vmem:[%s997_s1 + $0xe8] sm:$0xff]  ;;  %v25_v0 = vshrl.u32 %v24_v49, 7 }
   0x3   :  { %v84_v5 = vld [vmem:[%s997_s1 + $0x70] sm:$0xff]  ;;  %v85_v6 = vld [vmem:[%s997_s1 + $0x78] sm:$0xff]  ;;  %v229_v7 = vpack.c.bf16 %v133_v4, %v132_v2  ;;  %v130_v14 = vld [vmem:[%s997_s1 + $0x1e0] sm:$0xff]  ;;  %v212_v16 = vpack.c.bf16 %v99_v13, %v98_v11  ;;  %v23_v63 = vunpack.c.0.s8 %v22_v48 }
   0x4   :  { %v205_v8 = vpack.c.bf16 %v85_v6, %v84_v5  ;;  %v116_v9 = vld [vmem:[%s997_s1 + $0x170] sm:$0xff]  ;;  %v117_v10 = vld [vmem:[%s997_s1 + $0x178] sm:$0xff]  ;;  %446 = vmatprep.subr.bf16.mxu0 %v213_v3  ;;  %v131_v15 = vld [vmem:[%s997_s1 + $0x1e8] sm:$0xff] }
   0x5   :  { %v221_v12 = vpack.c.bf16 %v117_v10, %v116_v9  ;;  %468 = vmatprep.subr.bf16.mxu1 %v229_v7  ;;  %v228_v17 = vpack.c.bf16 %v131_v15, %v130_v14  ;;  %v82_v18 = vld [vmem:[%s997_s1 + $0x60] sm:$0xff]  ;;  %v83_v19 = vld [vmem:[%s997_s1 + $0x68] sm:$0xff]  ;;  %v96_v23 = vld [vmem:[%s997_s1 + $0xd0] sm:$0xff]  ;;  %v732_v13 = vsub.s32 %v23_v63, %v25_v0 }
   0x6   :  { %447 = vmatpush3.bf16.msra.mxu0 %v205_v8  ;;  %v114_v20 = vld [vmem:[%s997_s1 + $0x160] sm:$0xff]  ;;  %v204_v21 = vpack.c.bf16 %v83_v19, %v82_v18  ;;  %v115_v22 = vld [vmem:[%s997_s1 + $0x168] sm:$0xff]  ;;  %v97_v24 = vld [vmem:[%s997_s1 + $0xd8] sm:$0xff] }
   0x7   :  { %469 = vmatpush3.bf16.msra.mxu1 %v221_v12  ;;  %448 = vmatprep.subr.bf16.mxu0 %v212_v16  ;;  %v220_v25 = vpack.c.bf16 %v115_v22, %v114_v20  ;;  %v211_v26 = vpack.c.bf16 %v97_v24, %v96_v23  ;;  %v128_v27 = vld [vmem:[%s997_s1 + $0x1d0] sm:$0xff]  ;;  %v129_v28 = vld [vmem:[%s997_s1 + $0x1d8] sm:$0xff]  ;;  %v94_v35 = vld [vmem:[%s997_s1 + $0xc0] sm:$0xff] }
   0x8   :  { %470 = vmatprep.subr.bf16.mxu1 %v228_v17  ;;  %v80_v29 = vld [vmem:[%s997_s1 + $0x50] sm:$0xff]  ;;  %v227_v30 = vpack.c.bf16 %v129_v28, %v128_v27  ;;  %v81_v31 = vld [vmem:[%s997_s1 + $0x58] sm:$0xff]  ;;  %v95_v36 = vld [vmem:[%s997_s1 + $0xc8] sm:$0xff] }
   0x9   :  { %v112_v32 = vld [vmem:[%s997_s1 + $0x150] sm:$0xff]  ;;  %v113_v33 = vld [vmem:[%s997_s1 + $0x158] sm:$0xff]  ;;  %v203_v34 = vpack.c.bf16 %v81_v31, %v80_v29  ;;  %v126_v37 = vld [vmem:[%s997_s1 + $0x1c0] sm:$0xff]  ;;  %v210_v39 = vpack.c.bf16 %v95_v36, %v94_v35 }
   0xa   :  { %449 = vmatpush3.bf16.msra.mxu0 %v204_v21  ;;  %v219_v38 = vpack.c.bf16 %v113_v33, %v112_v32  ;;  %v127_v40 = vld [vmem:[%s997_s1 + $0x1c8] sm:$0xff]  ;;  %v78_v41 = vld [vmem:[%s997_s1 + $0x40] sm:$0xff]  ;;  %v92_v46 = vld [vmem:[%s997_s1 + $0xb0] sm:$0xff] }
   0xb   :  { %471 = vmatpush3.bf16.msra.mxu1 %v220_v25  ;;  %450 = vmatprep.subr.bf16.mxu0 %v211_v26  ;;  %v79_v42 = vld [vmem:[%s997_s1 + $0x48] sm:$0xff]  ;;  %v226_v43 = vpack.c.bf16 %v127_v40, %v126_v37  ;;  %v110_v44 = vld [vmem:[%s997_s1 + $0x140] sm:$0xff]  ;;  %v93_v50 = vld [vmem:[%s997_s1 + $0xb8] sm:$0xff] }
   0xc   :  { %472 = vmatprep.subr.bf16.mxu1 %v227_v30  ;;  %v111_v45 = vld [vmem:[%s997_s1 + $0x148] sm:$0xff]  ;;  %v124_v51 = vld [vmem:[%s997_s1 + $0x1b0] sm:$0xff]  ;;  %v125_v52 = vld [vmem:[%s997_s1 + $0x1b8] sm:$0xff]  ;;  %v202_v53 = vpack.c.bf16 %v79_v42, %v78_v41  ;;  %v209_v55 = vpack.c.bf16 %v93_v50, %v92_v46 }
   0xd   :  { %v218_v54 = vpack.c.bf16 %v111_v45, %v110_v44  ;;  %v76_v56 = vld [vmem:[%s997_s1 + $0x30] sm:$0xff]  ;;  %v77_v57 = vld [vmem:[%s997_s1 + $0x38] sm:$0xff]  ;;  %v225_v59 = vpack.c.bf16 %v125_v52, %v124_v51  ;;  %v90_v61 = vld [vmem:[%s997_s1 + $0xa0] sm:$0xff] }
   0xe   :  { %451 = vmatpush3.bf16.msra.mxu0 %v203_v34  ;;  %v108_v58 = vld [vmem:[%s997_s1 + $0x130] sm:$0xff]  ;;  %v109_v60 = vld [vmem:[%s997_s1 + $0x138] sm:$0xff]  ;;  %v91_v62 = vld [vmem:[%s997_s1 + $0xa8] sm:$0xff]  ;;  %v201_v3 = vpack.c.bf16 %v77_v57, %v76_v56 }
   0xf   :  { %473 = vmatpush3.bf16.msra.mxu1 %v219_v38  ;;  %452 = vmatprep.subr.bf16.mxu0 %v210_v39  ;;  %v122_v1 = vld [vmem:[%s997_s1 + $0x1a0] sm:$0xff]  ;;  %v123_v2 = vld [vmem:[%s997_s1 + $0x1a8] sm:$0xff]  ;;  %v217_v4 = vpack.c.bf16 %v109_v60, %v108_v58  ;;  %v208_v5 = vpack.c.bf16 %v91_v62, %v90_v61  ;;  %v88_v11 = vld [vmem:[%s997_s1 + $0x90] sm:$0xff] }
  0x10   :  { %474 = vmatprep.subr.bf16.mxu1 %v226_v43  ;;  %v74_v6 = vld [vmem:[%s997_s1 + $0x20] sm:$0xff]  ;;  %v75_v7 = vld [vmem:[%s997_s1 + $0x28] sm:$0xff]  ;;  %v224_v9 = vpack.c.bf16 %v123_v2, %v122_v1  ;;  %v89_v12 = vld [vmem:[%s997_s1 + $0x98] sm:$0xff] }
  0x11   :  { %v106_v8 = vld [vmem:[%s997_s1 + $0x120] sm:$0xff]  ;;  %v107_v10 = vld [vmem:[%s997_s1 + $0x128] sm:$0xff]  ;;  %v120_v14 = vld [vmem:[%s997_s1 + $0x190] sm:$0xff]  ;;  %v200_v16 = vpack.c.bf16 %v75_v7, %v74_v6  ;;  %v207_v19 = vpack.c.bf16 %v89_v12, %v88_v11 }
  0x12   :  { %453 = vmatpush3.bf16.msra.mxu0 %v202_v53  ;;  %v121_v15 = vld [vmem:[%s997_s1 + $0x198] sm:$0xff]  ;;  %v72_v17 = vld [vmem:[%s997_s1 + $0x10] sm:$0xff]  ;;  %v216_v18 = vpack.c.bf16 %v107_v10, %v106_v8  ;;  %v16_v22 = vld [vmem:[%s996_s0] sm:$0xff] }
  0x13   :  { %475 = vmatpush3.bf16.msra.mxu1 %v218_v54  ;;  %454 = vmatprep.subr.bf16.mxu0 %v209_v55  ;;  %v73_v20 = vld [vmem:[%s997_s1 + $0x18] sm:$0xff]  ;;  %v104_v21 = vld [vmem:[%s997_s1 + $0x110] sm:$0xff]  ;;  %v223_v23 = vpack.c.bf16 %v121_v15, %v120_v14  ;;  %v86_v25 = vld [vmem:[%s997_s1 + $0x80] sm:$0xff]  ;;  %v27_v27 = vrot.slane %v16_v22, %v732_v13  ;;  %v20_v28 = vcombine.high %v16_v22, %v16_v22 }
  0x14   :  { %476 = vmatprep.subr.bf16.mxu1 %v225_v59  ;;  %v105_v24 = vld [vmem:[%s997_s1 + $0x118] sm:$0xff]  ;;  %v87_v26 = vld [vmem:[%s997_s1 + $0x88] sm:$0xff]  ;;  %v118_v29 = vld [vmem:[%s997_s1 + $0x180] sm:$0xff]  ;;  %v199_v31 = vpack.c.bf16 %v73_v20, %v72_v17 }
  0x15   :  { %v119_v30 = vld [vmem:[%s997_s1 + $0x188] sm:$0xff]  ;;  %v35_v32 = vcombine.high %v27_v27, %v27_v27  ;;  %v34_v33 = vrot.slane %v20_v28, %v732_v13  ;;  %v215_v34 = vpack.c.bf16 %v105_v24, %v104_v21  ;;  %v206_v35 = vpack.c.bf16 %v87_v26, %v86_v25  ;;  %v70_v36 = vld [vmem:[%s997_s1] sm:$0xff]  ;;  %v164_v43 = vld [vmem:[%s997_s1 + $0x2f0] sm:$0xff] }
  0x16   :  { %455 = vmatpush3.bf16.msra.mxu0 %v201_v3  ;;  %v71_v37 = vld [vmem:[%s997_s1 + $0x8] sm:$0xff]  ;;  %v102_v38 = vld [vmem:[%s997_s1 + $0x100] sm:$0xff]  ;;  %v222_v39 = vpack.c.bf16 %v119_v30, %v118_v29  ;;  %v165_v44 = vld [vmem:[%s997_s1 + $0x2f8] sm:$0xff]  ;;  %v62_v58 = vpack.c.bf16 %v27_v27, %v27_v27 }
  0x17   :  { %477 = vmatpush3.bf16.msra.mxu1 %v217_v4  ;;  %456 = vmatprep.subr.bf16.mxu0 %v208_v5  ;;  %v103_v40 = vld [vmem:[%s997_s1 + $0x108] sm:$0xff]  ;;  %v63_v41 = vpack.c.bf16 %v35_v32, %v35_v32  ;;  %v36_v42 = vcombine.high %v34_v33, %v34_v33  ;;  %v196_v45 = vld [vmem:[%s997_s1 + $0x3f0] sm:$0xff]  ;;  %v197_v46 = vld [vmem:[%s997_s1 + $0x3f8] sm:$0xff]  ;;  %v198_v47 = vpack.c.bf16 %v71_v37, %v70_v36 }
  0x18   :  { %478 = vmatprep.subr.bf16.mxu1 %v224_v9  ;;  %v214_v49 = vpack.c.bf16 %v103_v40, %v102_v38  ;;  %v245_v50 = vpack.c.bf16 %v165_v44, %v164_v43  ;;  %v148_v51 = vld [vmem:[%s997_s1 + $0x270] sm:$0xff]  ;;  %v149_v52 = vld [vmem:[%s997_s1 + $0x278] sm:$0xff]  ;;  %v261_v54 = vpack.c.bf16 %v197_v46, %v196_v45  ;;  %v162_v56 = vld [vmem:[%s997_s1 + $0x2e0] sm:$0xff]  ;;  %v64_v61 = vpack.c.bf16 %v34_v33, %v34_v33 }
  0x19   :  { %301 = vmatprep.mubr.bf16.mxu0 %v63_v41  ;;  %v65_v48 = vpack.c.bf16 %v36_v42, %v36_v42  ;;  %v180_v53 = vld [vmem:[%s997_s1 + $0x370] sm:$0xff]  ;;  %v181_v55 = vld [vmem:[%s997_s1 + $0x378] sm:$0xff]  ;;  %v163_v57 = vld [vmem:[%s997_s1 + $0x2e8] sm:$0xff]  ;;  %v237_v62 = vpack.c.bf16 %v149_v52, %v148_v51 }
  0x1a   :  { %457 = vmatpush3.bf16.msra.mxu0 %v200_v16  ;;  %v194_v59 = vld [vmem:[%s997_s1 + $0x3e0] sm:$0xff]  ;;  %v195_v60 = vld [vmem:[%s997_s1 + $0x3e8] sm:$0xff]  ;;  %v253_v63 = vpack.c.bf16 %v181_v55, %v180_v53  ;;  %v244_v0 = vpack.c.bf16 %v163_v57, %v162_v56  ;;  %v160_v6 = vld [vmem:[%s997_s1 + $0x2d0] sm:$0xff] }
  0x1b   :  { %479 = vmatpush3.bf16.msra.mxu1 %v216_v18  ;;  %458 = vmatprep.subr.bf16.mxu0 %v207_v19  ;;  %v146_v1 = vld [vmem:[%s997_s1 + $0x260] sm:$0xff]  ;;  %v147_v2 = vld [vmem:[%s997_s1 + $0x268] sm:$0xff]  ;;  %v260_v4 = vpack.c.bf16 %v195_v60, %v194_v59  ;;  %v161_v7 = vld [vmem:[%s997_s1 + $0x2d8] sm:$0xff] }
  0x1c   :  { %480 = vmatprep.subr.bf16.mxu1 %v223_v23  ;;  %341 = vmatprep.mubr.bf16.mxu1 %v65_v48  ;;  %v178_v3 = vld [vmem:[%s997_s1 + $0x360] sm:$0xff]  ;;  %v179_v5 = vld [vmem:[%s997_s1 + $0x368] sm:$0xff]  ;;  %v192_v8 = vld [vmem:[%s997_s1 + $0x3d0] sm:$0xff]  ;;  %v236_v10 = vpack.c.bf16 %v147_v2, %v146_v1  ;;  %v243_v12 = vpack.c.bf16 %v161_v7, %v160_v6 }
  0x1d   :  { %v193_v9 = vld [vmem:[%s997_s1 + $0x3d8] sm:$0xff]  ;;  %v252_v11 = vpack.c.bf16 %v179_v5, %v178_v3  ;;  %v144_v14 = vld [vmem:[%s997_s1 + $0x250] sm:$0xff]  ;;  %v158_v19 = vld [vmem:[%s997_s1 + $0x2c0] sm:$0xff] }
  0x1e   :  { %459 = vmatpush3.bf16.msra.mxu0 %v199_v31  ;;  %v145_v15 = vld [vmem:[%s997_s1 + $0x258] sm:$0xff]  ;;  %v176_v16 = vld [vmem:[%s997_s1 + $0x350] sm:$0xff]  ;;  %v259_v17 = vpack.c.bf16 %v193_v9, %v192_v8  ;;  %v159_v20 = vld [vmem:[%s997_s1 + $0x2c8] sm:$0xff] }
  0x1f   :  { %481 = vmatpush3.bf16.msra.mxu1 %v215_v34  ;;  %460 = vmatprep.subr.bf16.mxu0 %v206_v35  ;;  %v177_v18 = vld [vmem:[%s997_s1 + $0x358] sm:$0xff]  ;;  %v190_v21 = vld [vmem:[%s997_s1 + $0x3c0] sm:$0xff]  ;;  %v191_v22 = vld [vmem:[%s997_s1 + $0x3c8] sm:$0xff]  ;;  %v235_v23 = vpack.c.bf16 %v145_v15, %v144_v14  ;;  %v242_v26 = vpack.c.bf16 %v159_v20, %v158_v19 }
  0x20   :  { %482 = vmatprep.subr.bf16.mxu1 %v222_v39  ;;  %v142_v24 = vld [vmem:[%s997_s1 + $0x240] sm:$0xff]  ;;  %v251_v25 = vpack.c.bf16 %v177_v18, %v176_v16  ;;  %v143_v27 = vld [vmem:[%s997_s1 + $0x248] sm:$0xff]  ;;  %v258_v30 = vpack.c.bf16 %v191_v22, %v190_v21  ;;  %v156_v31 = vld [vmem:[%s997_s1 + $0x2b0] sm:$0xff] }
  0x21   :  { %v174_v28 = vld [vmem:[%s997_s1 + $0x340] sm:$0xff]  ;;  %v175_v29 = vld [vmem:[%s997_s1 + $0x348] sm:$0xff]  ;;  %v157_v32 = vld [vmem:[%s997_s1 + $0x2b8] sm:$0xff] }
  0x22   :  { %461 = vmatpush3.bf16.msra.mxu0 %v198_v47  ;;  %v188_v33 = vld [vmem:[%s997_s1 + $0x3b0] sm:$0xff]  ;;  %v189_v34 = vld [vmem:[%s997_s1 + $0x3b8] sm:$0xff]  ;;  %v17_v35 = vld [vmem:[%s996_s0 + $0x8] sm:$0xff] }
  0x23   :  { %483 = vmatpush3.bf16.msra.mxu1 %v214_v49  ;;  %490 = vmatprep.subr.bf16.mxu0 %v245_v50 }
  0x24   :  { %512 = vmatprep.subr.bf16.mxu1 %v261_v54 }
  0x25   :  { %302 = vmatmul.mubr.bf16.vlgmr.msra.gmra.mxu0 %v62_v58 }
  0x26   :  { %342 = vmatmul.mubr.bf16.vlgmr.msra.gmra.mxu1 %v64_v61  ;;  %491 = vmatpush3.bf16.msra.mxu0 %v237_v62 }
  0x27   :  { %513 = vmatpush3.bf16.msra.mxu1 %v253_v63  ;;  %492 = vmatprep.subr.bf16.mxu0 %v244_v0 }
  0x28   :  { %514 = vmatprep.subr.bf16.mxu1 %v260_v4 }
  0x2a   :  { %493 = vmatpush3.bf16.msra.mxu0 %v236_v10 }
  0x2b   :  { %515 = vmatpush3.bf16.msra.mxu1 %v252_v11  ;;  %494 = vmatprep.subr.bf16.mxu0 %v243_v12 }
  0x2c   :  { %516 = vmatprep.subr.bf16.mxu1 %v259_v17 }
  0x2d   :  { %8 = vsyncpa [#allocation3], 0  ;;  %v234_v36 = vpack.c.bf16 %v143_v27, %v142_v24  ;;  %v893_v37 = vrot.slane %v17_v35, %v732_v13  ;;  %v37_v38 = vcombine.high %v17_v35, %v17_v35  ;;  %v250_v39 = vpack.c.bf16 %v175_v29, %v174_v28  ;;  %v140_v41 = vld [vmem:[%s997_s1 + $0x230] sm:$0xff]  ;;  %v141_v42 = vld [vmem:[%s997_s1 + $0x238] sm:$0xff]  ;;  %s561_s28 = smov [#allocation2]  }
  0x2e   :  { %495 = vmatpush3.bf16.msra.mxu0 %v235_v23  ;;  %v241_v40 = vpack.c.bf16 %v157_v32, %v156_v31  ;;  %v172_v43 = vld [vmem:[%s997_s1 + $0x330] sm:$0xff]  ;;  %v257_v44 = vpack.c.bf16 %v189_v34, %v188_v33  ;;  %v173_v45 = vld [vmem:[%s997_s1 + $0x338] sm:$0xff]  ;;  %v154_v46 = vld [vmem:[%s997_s1 + $0x2a0] sm:$0xff]  ;;  %v233_v52 = vpack.c.bf16 %v141_v42, %v140_v41  ;;  %s437_s29 = sshll.u32 %s561_s28, 4  ;;  %vm429_vm0 = vcmask 25600   ;;  %s438_s29 = int_to_ptr.vmem [resolvable:$true] %s437_s29 }
  0x2f   :  { %517 = vmatpush3.bf16.msra.mxu1 %v251_v25  ;;  %496 = vmatprep.subr.bf16.mxu0 %v242_v26  ;;  %v155_v47 = vld [vmem:[%s997_s1 + $0x2a8] sm:$0xff]  ;;  %v52_v48 = vcombine.high %v893_v37, %v893_v37  ;;  %v916_v49 = vrot.slane %v37_v38, %v732_v13  ;;  %v186_v50 = vld [vmem:[%s997_s1 + $0x3a0] sm:$0xff]  ;;  %v249_v55 = vpack.c.bf16 %v173_v45, %v172_v43  ;;  %v152_v61 = vld [vmem:[%s997_s1 + $0x290] sm:$0xff]  ;;  %p543_p1 = scmp.lt.s32.totalorder %s438_s29, %s438_s29 }
  0x30   :  { %518 = vmatprep.subr.bf16.mxu1 %v258_v30  ;;  %v187_v51 = vld [vmem:[%s997_s1 + $0x3a8] sm:$0xff]  ;;  %v240_v56 = vpack.c.bf16 %v155_v47, %v154_v46  ;;  %v138_v13 = vld [vmem:[%s997_s1 + $0x220] sm:$0xff]  ;;  %v153_v62 = vld [vmem:[%s997_s1 + $0x298] sm:$0xff]  ;;  %v66_v25 = vpack.c.bf16 %v893_v37, %v893_v37 }
  0x31   :  { %v67_v53 = vpack.c.bf16 %v52_v48, %v52_v48  ;;  %v53_v54 = vcombine.high %v916_v49, %v916_v49  ;;  %v139_v57 = vld [vmem:[%s997_s1 + $0x228] sm:$0xff]  ;;  %v170_v58 = vld [vmem:[%s997_s1 + $0x320] sm:$0xff]  ;;  %v256_v59 = vpack.c.bf16 %v187_v51, %v186_v50  ;;  %v184_v0 = vld [vmem:[%s997_s1 + $0x390] sm:$0xff]  ;;  %v239_v4 = vpack.c.bf16 %v153_v62, %v152_v61 }
  0x32   :  { %497 = vmatpush3.bf16.msra.mxu0 %v234_v36  ;;  %v171_v60 = vld [vmem:[%s997_s1 + $0x328] sm:$0xff]  ;;  %v185_v1 = vld [vmem:[%s997_s1 + $0x398] sm:$0xff]  ;;  %v232_v2 = vpack.c.bf16 %v139_v57, %v138_v13  ;;  %v136_v5 = vld [vmem:[%s997_s1 + $0x210] sm:$0xff]  ;;  %v68_v26 = vpack.c.bf16 %v916_v49, %v916_v49 }
  0x33   :  { %519 = vmatpush3.bf16.msra.mxu1 %v250_v39  ;;  %498 = vmatprep.subr.bf16.mxu0 %v241_v40  ;;  %v69_v63 = vpack.c.bf16 %v53_v54, %v53_v54  ;;  %v248_v3 = vpack.c.bf16 %v171_v60, %v170_v58  ;;  %v137_v6 = vld [vmem:[%s997_s1 + $0x218] sm:$0xff]  ;;  %v168_v7 = vld [vmem:[%s997_s1 + $0x310] sm:$0xff]  ;;  %v255_v8 = vpack.c.bf16 %v185_v1, %v184_v0  ;;  %v150_v10 = vld [vmem:[%s997_s1 + $0x280] sm:$0xff] }
  0x34   :  { %520 = vmatprep.subr.bf16.mxu1 %v257_v44  ;;  %381 = vmatprep.mubr.bf16.mxu0 %v67_v53  ;;  %v169_v9 = vld [vmem:[%s997_s1 + $0x318] sm:$0xff]  ;;  %v151_v11 = vld [vmem:[%s997_s1 + $0x288] sm:$0xff]  ;;  %v182_v12 = vld [vmem:[%s997_s1 + $0x380] sm:$0xff]  ;;  %v231_v15 = vpack.c.bf16 %v137_v6, %v136_v5 }
  0x35   :  { %421 = vmatprep.mubr.bf16.mxu1 %v69_v63  ;;  %v183_v14 = vld [vmem:[%s997_s1 + $0x388] sm:$0xff]  ;;  %v247_v16 = vpack.c.bf16 %v169_v9, %v168_v7  ;;  %v238_v17 = vpack.c.bf16 %v151_v11, %v150_v10  ;;  %v134_v18 = vld [vmem:[%s997_s1 + $0x200] sm:$0xff] }
  0x36   :  { %499 = vmatpush3.bf16.msra.mxu0 %v233_v52  ;;  %v135_v19 = vld [vmem:[%s997_s1 + $0x208] sm:$0xff]  ;;  %v254_v20 = vpack.c.bf16 %v183_v14, %v182_v12  ;;  %v166_v21 = vld [vmem:[%s997_s1 + $0x300] sm:$0xff] }
  0x37   :  { %521 = vmatpush3.bf16.msra.mxu1 %v249_v55  ;;  %500 = vmatprep.subr.bf16.mxu0 %v240_v56  ;;  %v167_v22 = vld [vmem:[%s997_s1 + $0x308] sm:$0xff]  ;;  %v230_v23 = vpack.c.bf16 %v135_v19, %v134_v18  ;;  %v445_v36 = vld [vmem:[%s998_s2] ss:$0 sm:$0xff]  ;;  %s538_s2 = scalar_lea.vmem %s438_s29, 32 }
  0x38   :  { %522 = vmatprep.subr.bf16.mxu1 %v256_v59  ;;  %v246_v24 = vpack.c.bf16 %v167_v22, %v166_v21  ;;  %p539_p0 = scmp.ne.s32.totalorder %s438_s29, %s538_s2  ;;  %p544_p2 = scmp.lt.s32.totalorder %s538_s2, %s538_s2 }
  0x3a   :  { %501 = vmatpush3.bf16.msra.mxu0 %v232_v2  ;;  %p545_p3 = por %p544_p2, %p543_p1 }
  0x3b   :  { %523 = vmatpush3.bf16.msra.mxu1 %v248_v3  ;;  %502 = vmatprep.subr.bf16.mxu0 %v239_v4 }
  0x3c   :  { %524 = vmatprep.subr.bf16.mxu1 %v255_v8  ;;  %p546_p4 = pnand %p545_p3, %p539_p0 }
  0x3e   :  { %503 = vmatpush3.bf16.msra.mxu0 %v231_v15 }
  0x3f   :  { %525 = vmatpush3.bf16.msra.mxu1 %v247_v16  ;;  %504 = vmatprep.subr.bf16.mxu0 %v238_v17 }
  0x40   :  { %526 = vmatprep.subr.bf16.mxu1 %v254_v20 }
  0x42   :  { %505 = vmatpush3.bf16.msra.mxu0 %v230_v23 }
  0x43   :  { %527 = vmatpush3.bf16.msra.mxu1 %v246_v24 }
  0x45   :  { %382 = vmatmul.mubr.bf16.vlgmr.msra.gmra.mxu0 %v66_v25 }
  0x46   :  { %422 = vmatmul.mubr.bf16.vlgmr.msra.gmra.mxu1 %v68_v26 }
  0xe5   :  { %v462_v27 = vpop.f32.mrf.mxu0 }
  0xe6   :  { %v484_v28 = vpop.f32.mrf.mxu1 }
  0xe7   :  { %v463_v29 = vpop.f32.mrf.mxu0 }
  0xe8   :  { %v485_v30 = vpop.f32.mrf.mxu1  ;;  %v464_v35 = vadd.f32 %v463_v29, %v462_v27 }
  0xe9   :  { %v465_v31 = vpop.f32.mrf.mxu0  ;;  %v486_v38 = vadd.f32 %v485_v30, %v484_v28 }
  0xea   :  { %v487_v32 = vpop.f32.mrf.mxu1  ;;  %v304_v37 = vadd.f32 %v464_v35, %v445_v36 }
  0xeb   :  { %v466_v33 = vpop.f32.mrf.mxu0 }
  0xec   :  { %v488_v34 = vpop.f32.mrf.mxu1  ;;  %v344_v42 = vadd.f32 %v486_v38, %v304_v37 }
 0x105   :  { %v506_v39 = vpop.f32.mrf.mxu0 }
 0x106   :  { %v528_v40 = vpop.f32.mrf.mxu1 }
 0x107   :  { %v507_v41 = vpop.f32.mrf.mxu0 }
 0x108   :  { %v508_v43 = vadd.f32 %v507_v41, %v506_v39  ;;  %v529_v44 = vpop.f32.mrf.mxu1 }
 0x109   :  { %v509_v45 = vpop.f32.mrf.mxu0  ;;  %v530_v47 = vadd.f32 %v529_v44, %v528_v40 }
 0x10a   :  { %v384_v46 = vadd.f32 %v508_v43, %v344_v42  ;;  %v531_v48 = vpop.f32.mrf.mxu1 }
 0x10b   :  { %v510_v49 = vpop.f32.mrf.mxu0 }
 0x10c   :  { %v424_v50 = vadd.f32 %v530_v47, %v384_v46  ;;  %v532_v51 = vpop.f32.mrf.mxu1 }
 0x10e   :  { %430 = vst.msk [vmem:[#allocation2] sm:$0x3] %vm429_vm0, %v424_v50 }
 0x10f   :  { %549 = shalt.err (!%p546_p4)
}
 0x110   :  { %440 = dma.vmem_to_hbm [thread:$0]  %s438_s29, 32, %s999_s3, [#allocation3]  }
 0x111   :  { %558 = dma.done.wait [#allocation3], 32  }
 0x112   :  { %559 = vsyncadd [#allocation3], 4294967264 }
 0x113   :  { %444 = vsyncpa [#allocation3], 1 }

</bundles_post_ra>
